<compile_context>
chip_gen: v7x
topology: tpu7x:2x2x1
jax: 0.10.0
libtpu: 0.0.40
codegen_flags: <defaults>
</compile_context>

<pallas_src>
import functools

import jax
import jax.numpy as jnp
from jax.experimental import pallas as pl
from jax.experimental.pallas import tpu as pltpu


def _slad_kernel(yp_ref, yt_ref, js_ref):
    """Per-row Jensen-Shannon-like loss on a (tb, D) tile.

    js[b] = sum_d m*(log m - log_softmax(p)) + m*(log m - log_softmax(q))
    with p = softmax(y_pred)+1e-6, q = softmax(y_true)+1e-6, m = 0.5*(p+q),
    matching the PyTorch module's double-softmax semantics exactly.
    """
    # Inputs keep their HBM dtype (f32 or bf16) through the BlockSpec and are
    # upcast here; math stays f32 (v5e VPU/EUP have no bf16).
    yp = yp_ref[...].astype(jnp.float32)
    yt = yt_ref[...].astype(jnp.float32)

    def row_reciprocal(s):
        # Approximate EUP reciprocal of the per-row sum + one Newton-Raphson
        # refinement: keeps the per-element work as a VPU multiply (no
        # per-element divide) while retaining ~f32 accuracy.
        r = pl.reciprocal(s, approx=True)
        return r * (2.0 - s * r)

    def softmax(x):
        mx = jnp.max(x, axis=-1, keepdims=True)
        e = jnp.exp(x - mx)
        return e * row_reciprocal(jnp.sum(e, axis=-1, keepdims=True))

    p = softmax(yp) + 1e-6          # preds_smax
    q = softmax(yt) + 1e-6          # true_smax
    m = 0.5 * (p + q)               # total_m

    # log_softmax over already-softmaxed values: p, q in (1e-6, 1+1e-6], so
    # the usual max-shift is unnecessary (exp cannot overflow).  Do NOT apply
    # this simplification to the raw-logit softmax above.
    lp = p - jnp.log(jnp.sum(jnp.exp(p), axis=-1, keepdims=True))
    lq = q - jnp.log(jnp.sum(jnp.exp(q), axis=-1, keepdims=True))
    logm = jnp.log(m)

    # Fused tail: m*(logm - lp) + m*(logm - lq) == m*(2*logm - lp - lq).
    js_ref[...] = jnp.sum(m * (2.0 * logm - lp - lq), axis=-1, keepdims=True)


def _vmem_budgets():
    """Return (tile_budget_bytes, vmem_limit_bytes) for the current TPU gen."""
    kind = ""
    try:
        kind = jax.devices()[0].device_kind.lower()
    except Exception:  # pragma: no cover - defensive
        pass
    if "v7" in kind or "7x" in kind:
        # v7x: 64 MiB physical VMEM per TensorCore -> modest working set.
        return 20 << 20, 48 << 20
    if "v5" in kind or "v6" in kind:
        # v5e / v6e: 128 MiB physical VMEM (default scoped limit is 16/32 MiB,
        # so raise it for the bigger double-buffered blocks).
        return 48 << 20, 100 << 20
    # Unknown / older generation: stay conservative, keep default scoped VMEM.
    return 8 << 20, None


def _choose_batch_tile(B, D, budget_bytes):
    """Largest sublane-aligned batch tile whose working set fits the budget."""
    if B <= 8:
        return B
    # Note: for D < 128 only D of 128 lanes are active per vreg; we accept
    # that waste and rely on a large batch tile to stay HBM-bound.
    d_eff = max(D, 128)
    # ~12 live f32 (tb, D) slabs: 2 inputs x 2 pipeline buffers + ~8 f32
    # intermediates inside the kernel body.
    per_row = 12 * 4 * d_eff
    tb = budget_bytes // per_row
    tb = min(tb, 4096, B)
    if tb >= B and B >= 256:
        # Keep >= 2 grid steps so the "parallel" batch axis can shard across
        # v7x's two TensorCores (no-op on single-core v5e/v6e).
        tb = (B + 1) // 2
    if tb >= 128:
        tb = (tb // 128) * 128      # lane-friendly and sublane-aligned
    else:
        tb = max(8, (tb // 8) * 8)  # sublane-aligned minimum
    return tb


@functools.partial(jax.jit, static_argnames=("reduction",))
def slad_loss(y_pred, y_true, reduction="mean"):
    assert reduction in ("mean", "none", "sum")
    assert y_pred.ndim == 2 and y_pred.shape == y_true.shape
    B, D = y_pred.shape

    tile_budget, vmem_limit = _vmem_budgets()
    tb = _choose_batch_tile(B, D, tile_budget)
    grid = (pl.cdiv(B, tb),)
    # If B % tb != 0 the last tile reads Pallas-clamped rows; their (possibly
    # NaN) results are masked away on the write, and all math is row-local,
    # so correctness is unaffected.

    itemsize = jnp.dtype(y_pred.dtype).itemsize
    cost = pl.CostEstimate(
        flops=20 * B * D,
        transcendentals=5 * B * D,
        bytes_accessed=2 * B * D * itemsize + B * 4,
    )

    cp_kwargs = dict(dimension_semantics=("parallel",))
    if vmem_limit is not None:
        cp_kwargs["vmem_limit_bytes"] = vmem_limit

    js = pl.pallas_call(
        _slad_kernel,
        out_shape=jax.ShapeDtypeStruct((B, 1), jnp.float32),
        grid_spec=pltpu.PrefetchScalarGridSpec(
            num_scalar_prefetch=0,
            grid=grid,
            in_specs=[
                pl.BlockSpec((tb, D), lambda i: (i, 0)),
                pl.BlockSpec((tb, D), lambda i: (i, 0)),
            ],
            out_specs=pl.BlockSpec((tb, 1), lambda i: (i, 0)),
        ),
        compiler_params=pltpu.CompilerParams(**cp_kwargs),
        cost_estimate=cost,
    )(y_pred, y_true)

    js = js[:, 0]
    if reduction == "mean":
        return jnp.mean(js)
    if reduction == "sum":
        return jnp.sum(js)
    return js


def _slad_loss_ref(y_pred, y_true, reduction="mean"):
    """Pure-JAX reference mirroring the PyTorch module."""
    p = jax.nn.softmax(y_pred.astype(jnp.float32), axis=1) + 1e-6
    q = jax.nn.softmax(y_true.astype(jnp.float32), axis=1) + 1e-6
    m = 0.5 * (p + q)
    lp = jax.nn.log_softmax(p, axis=1)
    lq = jax.nn.log_softmax(q, axis=1)
    js = jnp.sum(m * (jnp.log(m) - lp) + m * (jnp.log(m) - lq), axis=1)
    if reduction == "mean":
        return jnp.mean(js)
    if reduction == "sum":
        return jnp.sum(js)
    return js


if __name__ == "__main__":
    key = jax.random.PRNGKey(0)
    k1, k2, k3, k4 = jax.random.split(key, 4)

    # Small demo shape: [batch_size, distribution_size].
    B1, D1 = 8, 32
    yp1 = jax.random.normal(k1, (B1, D1), dtype=jnp.float32)
    yt1 = jax.random.normal(k2, (B1, D1), dtype=jnp.float32)

    loss = slad_loss(yp1, yt1, reduction="mean")
    jax.block_until_ready(loss)
    ref = _slad_loss_ref(yp1, yt1, reduction="mean")
    assert jnp.allclose(loss, ref, rtol=1e-3, atol=1e-4), (loss, ref)

    js_none = slad_loss(yp1, yt1, reduction="none")
    jax.block_until_ready(js_none)
    ref_none = _slad_loss_ref(yp1, yt1, reduction="none")
    assert jnp.allclose(js_none, ref_none, rtol=1e-3, atol=1e-4), (js_none, ref_none)

    # Larger, ragged batch: exercises the multi-step grid, the 128-row tile
    # path and the masked edge tile (300 % 128 != 0).
    B2, D2 = 300, 256
    yp2 = jax.random.normal(k3, (B2, D2), dtype=jnp.float32)
    yt2 = jax.random.normal(k4, (B2, D2), dtype=jnp.float32)
    loss2 = slad_loss(yp2, yt2, reduction="sum")
    jax.block_until_ready(loss2)
    ref2 = _slad_loss_ref(yp2, yt2, reduction="sum")
    assert jnp.allclose(loss2, ref2, rtol=1e-3, atol=1e-2), (loss2, ref2)

    print("KERNEL_OK")
</pallas_src>

<mosaic_0001>
module attributes {stable_mosaic.version = 11 : i64} {
  func.func @_slad_kernel(%arg0: i32, %arg1: memref<8x32xf32, #tpu.memory_space<vmem>>, %arg2: memref<8x32xf32, #tpu.memory_space<vmem>>, %arg3: memref<8x1xf32, #tpu.memory_space<vmem>>) attributes {dimension_semantics = [#tpu.dimension_semantics<parallel>], iteration_bounds = array<i64: 1>, scalar_prefetch = 0 : i64, scratch_operands = 0 : i64, tpu.core_type = #tpu.core_type<tc>, window_params = [{transform_indices = @transform_0, window_bounds = array<i64: 8, 32>}, {transform_indices = @transform_1, window_bounds = array<i64: 8, 32>}, {transform_indices = @transform_2, window_bounds = array<i64: 8, 1>}]} {
    %c0 = arith.constant 0 : index
    %c0_0 = arith.constant 0 : index
    %0 = vector.load %arg1[%c0, %c0_0] : memref<8x32xf32, #tpu.memory_space<vmem>>, vector<8x32xf32>
    %c0_1 = arith.constant 0 : index
    %c0_2 = arith.constant 0 : index
    %1 = vector.load %arg2[%c0_1, %c0_2] : memref<8x32xf32, #tpu.memory_space<vmem>>, vector<8x32xf32>
    %cst = arith.constant dense<0xFF800000> : vector<8xf32>
    %2 = vector.multi_reduction <maximumf>, %0, %cst [1] : vector<8x32xf32> to vector<8xf32>
    %3 = vector.shape_cast %2 : vector<8xf32> to vector<8x1xf32>
    %4 = vector.broadcast %3 : vector<8x1xf32> to vector<8x32xf32>
    %5 = arith.subf %0, %4 : vector<8x32xf32>
    %6 = math.exp %5 : vector<8x32xf32>
    %cst_3 = arith.constant dense<0.000000e+00> : vector<8xf32>
    %7 = vector.multi_reduction <add>, %6, %cst_3 [1] : vector<8x32xf32> to vector<8xf32>
    %8 = vector.shape_cast %7 : vector<8xf32> to vector<8x1xf32>
    %9 = tpu.reciprocal %8 {approx = true} : vector<8x1xf32> -> vector<8x1xf32>
    %10 = arith.mulf %8, %9 : vector<8x1xf32>
    %cst_4 = arith.constant 2.000000e+00 : f32
    %11 = vector.broadcast %cst_4 : f32 to vector<8x1xf32>
    %12 = arith.subf %11, %10 : vector<8x1xf32>
    %13 = arith.mulf %9, %12 : vector<8x1xf32>
    %14 = vector.broadcast %13 : vector<8x1xf32> to vector<8x32xf32>
    %15 = arith.mulf %6, %14 : vector<8x32xf32>
    %cst_5 = arith.constant 9.99999997E-7 : f32
    %16 = vector.broadcast %cst_5 : f32 to vector<8x32xf32>
    %17 = arith.addf %15, %16 : vector<8x32xf32>
    %cst_6 = arith.constant dense<0xFF800000> : vector<8xf32>
    %18 = vector.multi_reduction <maximumf>, %1, %cst_6 [1] : vector<8x32xf32> to vector<8xf32>
    %19 = vector.shape_cast %18 : vector<8xf32> to vector<8x1xf32>
    %20 = vector.broadcast %19 : vector<8x1xf32> to vector<8x32xf32>
    %21 = arith.subf %1, %20 : vector<8x32xf32>
    %22 = math.exp %21 : vector<8x32xf32>
    %cst_7 = arith.constant dense<0.000000e+00> : vector<8xf32>
    %23 = vector.multi_reduction <add>, %22, %cst_7 [1] : vector<8x32xf32> to vector<8xf32>
    %24 = vector.shape_cast %23 : vector<8xf32> to vector<8x1xf32>
    %25 = tpu.reciprocal %24 {approx = true} : vector<8x1xf32> -> vector<8x1xf32>
    %26 = arith.mulf %24, %25 : vector<8x1xf32>
    %cst_8 = arith.constant 2.000000e+00 : f32
    %27 = vector.broadcast %cst_8 : f32 to vector<8x1xf32>
    %28 = arith.subf %27, %26 : vector<8x1xf32>
    %29 = arith.mulf %25, %28 : vector<8x1xf32>
    %30 = vector.broadcast %29 : vector<8x1xf32> to vector<8x32xf32>
    %31 = arith.mulf %22, %30 : vector<8x32xf32>
    %cst_9 = arith.constant 9.99999997E-7 : f32
    %32 = vector.broadcast %cst_9 : f32 to vector<8x32xf32>
    %33 = arith.addf %31, %32 : vector<8x32xf32>
    %34 = arith.addf %17, %33 : vector<8x32xf32>
    %cst_10 = arith.constant 5.000000e-01 : f32
    %35 = vector.broadcast %cst_10 : f32 to vector<8x32xf32>
    %36 = arith.mulf %35, %34 : vector<8x32xf32>
    %37 = math.exp %17 : vector<8x32xf32>
    %cst_11 = arith.constant dense<0.000000e+00> : vector<8xf32>
    %38 = vector.multi_reduction <add>, %37, %cst_11 [1] : vector<8x32xf32> to vector<8xf32>
    %39 = vector.shape_cast %38 : vector<8xf32> to vector<8x1xf32>
    %40 = math.log %39 : vector<8x1xf32>
    %41 = vector.broadcast %40 : vector<8x1xf32> to vector<8x32xf32>
    %42 = arith.subf %17, %41 : vector<8x32xf32>
    %43 = math.exp %33 : vector<8x32xf32>
    %cst_12 = arith.constant dense<0.000000e+00> : vector<8xf32>
    %44 = vector.multi_reduction <add>, %43, %cst_12 [1] : vector<8x32xf32> to vector<8xf32>
    %45 = vector.shape_cast %44 : vector<8xf32> to vector<8x1xf32>
    %46 = math.log %45 : vector<8x1xf32>
    %47 = vector.broadcast %46 : vector<8x1xf32> to vector<8x32xf32>
    %48 = arith.subf %33, %47 : vector<8x32xf32>
    %49 = math.log %36 : vector<8x32xf32>
    %cst_13 = arith.constant 2.000000e+00 : f32
    %50 = vector.broadcast %cst_13 : f32 to vector<8x32xf32>
    %51 = arith.mulf %50, %49 : vector<8x32xf32>
    %52 = arith.subf %51, %42 : vector<8x32xf32>
    %53 = arith.subf %52, %48 : vector<8x32xf32>
    %54 = arith.mulf %36, %53 : vector<8x32xf32>
    %cst_14 = arith.constant dense<0.000000e+00> : vector<8xf32>
    %55 = vector.multi_reduction <add>, %54, %cst_14 [1] : vector<8x32xf32> to vector<8xf32>
    %56 = vector.shape_cast %55 : vector<8xf32> to vector<8x1xf32>
    %c0_15 = arith.constant 0 : index
    %c0_16 = arith.constant 0 : index
    %57 = vector.load %arg3[%c0_15, %c0_16] : memref<8x1xf32, #tpu.memory_space<vmem>>, vector<8x1xf32>
    tpu.vector_store %arg3[%c0_15, %c0_16], %56 {strides = array<i32>} : memref<8x1xf32, #tpu.memory_space<vmem>>, vector<8x1xf32>,
    return
  }
  func.func @transform_0(%arg0: i32) -> (i32, i32) {
    %c0_i32 = arith.constant 0 : i32
    %c0_i32_0 = arith.constant 0 : i32
    return %arg0, %c0_i32 : i32, i32
  }
  func.func @transform_1(%arg0: i32) -> (i32, i32) {
    %c0_i32 = arith.constant 0 : i32
    %c0_i32_0 = arith.constant 0 : i32
    return %arg0, %c0_i32 : i32, i32
  }
  func.func @transform_2(%arg0: i32) -> (i32, i32) {
    %c0_i32 = arith.constant 0 : i32
    %c0_i32_0 = arith.constant 0 : i32
    return %arg0, %c0_i32 : i32, i32
  }
}

</mosaic_0001>

<bundles_post_ra>
// kernel: slad_loss.1
= control target key start
LH: loop header
LB: loop body
LE: loop exit
PB: predicated region body
PF: predicated region fallthrough
CT: control target
= control target key end

     0   :  { %7 = vsyncpa [#allocation3], 0  ;;  %s222_s0 = inlined_call_operand.hbm [shape: f32[8,32], index: 0, kind: input, shape index: {}]   ;;  %s223_s1 = inlined_call_operand.hbm [shape: f32[8,32], index: 1, kind: input, shape index: {}]   ;;  %s224_s2 = inlined_call_operand.vmem [shape: f32[8,1], index: 2, kind: output, shape index: {}]  }
   0x1   :  { %8 = vsyncpa [#allocation5], 0  ;;  %s171_s9 = smov [#allocation2]   ;;  %s172_s11 = smov [#allocation4]  }
   0x2   :  { %s15_s10 = sshll.u32 %s171_s9, 4  ;;  %s25_s12 = sshll.u32 %s172_s11, 4  ;;  %s16_s10 = int_to_ptr.vmem [resolvable:$true] %s15_s10  ;;  %s26_s12 = int_to_ptr.vmem [resolvable:$true] %s25_s12 }
   0x3   :  { %s123_s15 = scalar_lea.hbm %s222_s0, 128 }
   0x4   :  { %p124_p0 = scmp.ne.s32.totalorder %s222_s0, %s123_s15  ;;  %p127_p1 = scmp.lt.u32.totalorder %s123_s15, %s222_s0 }
   0x6   :  { %p129_p2 = pnand %p127_p1, %p124_p0 }
   0x8   :  { %132 = shalt.err (!%p129_p2)
}
   0x9   :  { %s133_s20 = scalar_lea.vmem %s16_s10, 128  ;;  %p138_p4 = scmp.lt.s32.totalorder %s16_s10, %s16_s10 }
   0xa   :  { %p134_p3 = scmp.ne.s32.totalorder %s16_s10, %s133_s20  ;;  %p139_p5 = scmp.lt.s32.totalorder %s133_s20, %s133_s20 }
   0xc   :  { %p140_p6 = por %p139_p5, %p138_p4 }
   0xe   :  { %p141_p7 = pnand %p140_p6, %p134_p3 }
  0x10   :  { %144 = shalt.err (!%p141_p7)
}
  0x11   :  { %18 = dma.hbm_to_vmem [thread:$0]  %s222_s0, 128, %s16_s10, [#allocation3]  }
  0x12   :  { %s145_s25 = scalar_lea.hbm %s223_s1, 128 }
  0x13   :  { %p146_p8 = scmp.ne.s32.totalorder %s223_s1, %s145_s25  ;;  %p149_p9 = scmp.lt.u32.totalorder %s145_s25, %s223_s1 }
  0x15   :  { %p151_p10 = pnand %p149_p9, %p146_p8 }
  0x17   :  { %154 = shalt.err (!%p151_p10)
}
  0x18   :  { %s155_s30 = scalar_lea.vmem %s26_s12, 128  ;;  %p160_p12 = scmp.lt.s32.totalorder %s26_s12, %s26_s12 }
  0x19   :  { %p156_p11 = scmp.ne.s32.totalorder %s26_s12, %s155_s30  ;;  %p161_p13 = scmp.lt.s32.totalorder %s155_s30, %s155_s30 }
  0x1b   :  { %p162_p0 = por %p161_p13, %p160_p12 }
  0x1d   :  { %p163_p1 = pnand %p162_p0, %p156_p11 }
  0x1f   :  { %166 = shalt.err (!%p163_p1)
}
  0x20   :  { %28 = dma.hbm_to_vmem [thread:$0]  %s223_s1, 128, %s26_s12, [#allocation5]  }
  0x21   :  { %167 = dma.done.wait [#allocation3], 128  }
  0x22   :  { %168 = vsyncadd [#allocation3], 4294967168 }
  0x23   :  { %169 = dma.done.wait [#allocation5], 128  }
  0x24   :  { %170 = vsyncadd [#allocation5], 4294967168  ;;  %vm37_vm0 = vcmask 261120   ;;  %v35_v0 = vld [vmem:[#allocation2] sm:$0xff]  ;;  %v36_v1 = vld [vmem:[#allocation4] sm:$0xff]  ;;  %vm95_vm1 = vcmask 7168  }
  0x25   :  { %v38_v2 = vsel %vm37_vm0, %v35_v0, -inf  ;;  %v53_v3 = vsel %vm37_vm0, %v36_v1, -inf }
  0x26   :  { %39 = vmax.xlane.f32.xlu0 %v38_v2 }
  0x2a   :  { %54 = vmax.xlane.f32.xlu0 %v53_v3 }
  0xb3   :  { %v40_v4 = vpop.xlane.xlu0 %39 }
  0xb4   :  { %v41_v5 = vsub.f32 %v35_v0, %v40_v4 }
  0xb6   :  { %v42_v6 = vmul.f32 1.442695, %v41_v5 }
  0xb7   :  { %v55_v7 = vpop.xlane.xlu0 %54 }
  0xb8   :  { %105 = vpow2.f32 %v42_v6  ;;  %v56_v8 = vsub.f32 %v36_v1, %v55_v7 }
  0xba   :  { %v57_v9 = vmul.f32 1.442695, %v56_v8 }
  0xbc   :  { %107 = vpow2.f32 %v57_v9 }
  0xc2   :  { %v106_v10 = vpop.eup %105 }
  0xc3   :  { %v44_v11 = vsel %vm37_vm0, %v106_v10, 0.0 }
  0xc4   :  { %45 = vadd.xlane.f32.xlu1 %v44_v11 }
  0xc6   :  { %v108_v12 = vpop.eup %107 }
  0xc7   :  { %v59_v13 = vsel %vm37_vm0, %v108_v12, 0.0 }
  0xc8   :  { %60 = vadd.xlane.f32.xlu1 %v59_v13 }
 0x151   :  { %v46_v14 = vpop.xlane.xlu1 %45 }
 0x152   :  { %109 = vrcp.f32 %v46_v14 }
 0x155   :  { %v61_v15 = vpop.xlane.xlu1 %60 }
 0x156   :  { %111 = vrcp.f32 %v61_v15 }
 0x15c   :  { %v110_v16 = vpop.eup %109 }
 0x15d   :  { %v48_v17 = vmul.f32 %v110_v16, %v46_v14 }
 0x15f   :  { %v49_v18 = vsub.f32 2.0, %v48_v17 }
 0x160   :  { %v112_v19 = vpop.eup %111 }
 0x161   :  { %v50_v20 = vmul.f32 %v110_v16, %v49_v18  ;;  %v63_v21 = vmul.f32 %v112_v19, %v61_v15 }
 0x163   :  { %v51_v22 = vmul.f32 %v106_v10, %v50_v20  ;;  %v64_v23 = vsub.f32 2.0, %v63_v21 }
 0x165   :  { %v52_v24 = vadd.f32 1e-06, %v51_v22  ;;  %v65_v25 = vmul.f32 %v112_v19, %v64_v23 }
 0x167   :  { %v70_v26 = vmul.f32 1.442695, %v52_v24  ;;  %v66_v27 = vmul.f32 %v108_v12, %v65_v25 }
 0x169   :  { %v67_v28 = vadd.f32 1e-06, %v66_v27  ;;  %113 = vpow2.f32 %v70_v26 }
 0x16b   :  { %v78_v29 = vmul.f32 1.442695, %v67_v28  ;;  %v68_v34 = vadd.f32 %v67_v28, %v52_v24 }
 0x16d   :  { %115 = vpow2.f32 %v78_v29  ;;  %v69_v35 = vmul.f32 0.5, %v68_v34 }
 0x16f   :  { %117 = vlog2.f32 %v69_v35 }
 0x173   :  { %v114_v30 = vpop.eup %113 }
 0x174   :  { %v72_v31 = vsel %vm37_vm0, %v114_v30, 0.0 }
 0x175   :  { %73 = vadd.xlane.f32.xlu0 %v72_v31 }
 0x177   :  { %v116_v32 = vpop.eup %115 }
 0x178   :  { %v80_v33 = vsel %vm37_vm0, %v116_v32, 0.0 }
 0x179   :  { %81 = vadd.xlane.f32.xlu1 %v80_v33  ;;  %v118_v38 = vpop.eup %117 }
 0x17a   :  { %v87_v41 = vmul.f32 0.6931472, %v118_v38 }
 0x17c   :  { %v88_v45 = vmul.f32 2.0, %v87_v41 }
 0x202   :  { %v74_v36 = vpop.xlane.xlu0 %73 }
 0x203   :  { %119 = vlog2.f32 %v74_v36 }
 0x206   :  { %v82_v37 = vpop.xlane.xlu1 %81 }
 0x207   :  { %121 = vlog2.f32 %v82_v37 }
 0x20d   :  { %v120_v39 = vpop.eup %119 }
 0x20e   :  { %v76_v40 = vmul.f32 0.6931472, %v120_v39 }
 0x210   :  { %v77_v42 = vsub.f32 %v52_v24, %v76_v40 }
 0x211   :  { %v122_v43 = vpop.eup %121 }
 0x212   :  { %v84_v44 = vmul.f32 0.6931472, %v122_v43  ;;  %v89_v47 = vsub.f32 %v88_v45, %v77_v42 }
 0x214   :  { %v85_v46 = vsub.f32 %v67_v28, %v84_v44 }
 0x216   :  { %v90_v48 = vsub.f32 %v89_v47, %v85_v46 }
 0x218   :  { %v91_v49 = vmul.f32 %v90_v48, %v69_v35 }
 0x21a   :  { %v92_v50 = vsel %vm37_vm0, %v91_v49, 0.0 }
 0x21b   :  { %93 = vadd.xlane.f32.xlu0 %v92_v50 }
 0x2a8   :  { %v94_v51 = vpop.xlane.xlu0 %93 }
 0x2a9   :  { %96 = vst.msk [vmem:[%s224_s2] sm:$0xff] %vm95_vm1, %v94_v51 }
 0x2aa   :  { %101 = vsyncpa [#allocation3], 1 }
 0x2ab   :  { %102 = vsyncpa [#allocation5], 1 }

</bundles_post_ra>
